<compile_context>
chip_gen: v7x
topology: tpu7x:2x2x1
jax: 0.10.0
libtpu: 0.0.40
codegen_flags: <defaults>
</compile_context>

<pallas_src>
import functools

import jax
import jax.numpy as jnp
from jax.experimental import pallas as pl
from jax.experimental.pallas import tpu as pltpu


def _round_up(x, m):
    return ((x + m - 1) // m) * m


def _mlp_kernel(x_ref, w1_ref, b1_ref, w2_ref, b2_ref, o_ref):
    # First linear layer on the MXU, f32 accumulation.
    h = jnp.dot(x_ref[...], w1_ref[...], preferred_element_type=jnp.float32)
    # Bias add + ReLU on the VPU, kept in f32 (no accumulator downcast).
    h = jnp.maximum(h + b1_ref[...], 0.0)
    # Second linear layer; h stays f32.
    out = jnp.dot(h, w2_ref[...], preferred_element_type=jnp.float32)
    out = out + b2_ref[...]
    o_ref[...] = out.astype(o_ref.dtype)


def _mlp_forward_impl(x, w1, b1, w2, b2, *, tm):
    """x: (B, D0), w1: (D0, D1), b1: (D1,), w2: (D1, D2), b2: (D2,) -> (B, D2)."""
    B, D0 = x.shape
    D1 = w1.shape[1]
    D2 = w2.shape[1]

    # Pad hidden/output feature dims to full 128-lane tiles (zero padding is
    # exact: padded hidden units are ReLU(0)=0 and padded output columns get
    # zero weights/bias, so the sliced result is unchanged).
    D1p = _round_up(D1, 128)
    D2p = _round_up(D2, 128)

    # Batch tile: at least one (8,)-aligned sublane group, at most `tm` rows.
    TM = min(tm, _round_up(B, 8))
    Bp = _round_up(B, TM)

    xp = jnp.pad(x, ((0, Bp - B), (0, 0)))
    w1p = jnp.pad(w1, ((0, 0), (0, D1p - D1)))
    b1p = jnp.pad(b1, (0, D1p - D1)).reshape(1, D1p)
    w2p = jnp.pad(w2, ((0, D1p - D1), (0, D2p - D2)))
    b2p = jnp.pad(b2, (0, D2p - D2)).reshape(1, D2p)

    grid = (Bp // TM,)

    bytes_accessed = 4 * (Bp * D0 + D0 * D1p + D1p + D1p * D2p + D2p + Bp * D2p)
    flops = 2 * Bp * D0 * D1p + 2 * Bp * D1p * D2p

    out_p = pl.pallas_call(
        _mlp_kernel,
        out_shape=jax.ShapeDtypeStruct((Bp, D2p), x.dtype),
        grid=grid,
        in_specs=[
            # Batch-tiled activations (auto double-buffered across the grid).
            pl.BlockSpec((TM, D0), lambda i: (i, 0)),
            # Weights / biases: full-extent blocks, resident across all tiles.
            pl.BlockSpec((D0, D1p), lambda i: (0, 0)),
            pl.BlockSpec((1, D1p), lambda i: (0, 0)),
            pl.BlockSpec((D1p, D2p), lambda i: (0, 0)),
            pl.BlockSpec((1, D2p), lambda i: (0, 0)),
        ],
        out_specs=pl.BlockSpec((TM, D2p), lambda i: (i, 0)),
        compiler_params=pltpu.CompilerParams(
            # Batch tiles are independent -> shardable across TensorCores.
            dimension_semantics=("parallel",),
            # Well under v7x's 64 MiB physical VMEM; plenty at these tiles.
            vmem_limit_bytes=32 * 1024 * 1024,
        ),
        cost_estimate=pl.CostEstimate(
            flops=flops, transcendentals=0, bytes_accessed=bytes_accessed
        ),
    )(xp, w1p, b1p, w2p, b2p)

    # Slice the logical result back out of the padded slab.
    return out_p[:B, :D2]


# Padding, pallas_call and slicing all fuse under one jit; `tm` is static.
mlp_forward = jax.jit(
    functools.partial(_mlp_forward_impl, tm=128)
)


def init_params(key, dims):
    """Deterministic init matching nn.Linear shapes.

    PyTorch stores weight as (out_features, in_features); we build them that
    way and transpose once to the kernel's (in, out) layout.
    """
    d0, d1 = dims
    k1, k2, k3, k4 = jax.random.split(key, 4)
    lim1 = 1.0 / jnp.sqrt(d0)
    lim2 = 1.0 / jnp.sqrt(d1)
    w1_pt = jax.random.uniform(k1, (d1, d0), jnp.float32, -lim1, lim1)
    b1 = jax.random.uniform(k2, (d1,), jnp.float32, -lim1, lim1)
    w2_pt = jax.random.uniform(k3, (10, d1), jnp.float32, -lim2, lim2)
    b2 = jax.random.uniform(k4, (10,), jnp.float32, -lim2, lim2)
    return w1_pt.T, b1, w2_pt.T, b2


def mlp_reference(x, w1, b1, w2, b2):
    h = jnp.maximum(x @ w1 + b1, 0.0)
    return h @ w2 + b2


if __name__ == "__main__":
    key = jax.random.PRNGKey(0)
    dims = (32, 64)          # dims[0] = input features, dims[1] = hidden
    batch = 8

    kx, kp = jax.random.split(key)
    x = jax.random.normal(kx, (batch, dims[0]), jnp.float32)
    w1, b1, w2, b2 = init_params(kp, dims)

    out = mlp_forward(x, w1, b1, w2, b2)
    out = jax.block_until_ready(out)

    ref = mlp_reference(x, w1, b1, w2, b2)
    assert out.shape == (batch, 10)
    assert jnp.allclose(out, ref, atol=1e-5, rtol=1e-5)

    print("KERNEL_OK")
</pallas_src>

<mosaic_0001>
module attributes {stable_mosaic.version = 11 : i64} {
  func.func @_mlp_kernel(%arg0: i32, %arg1: memref<8x32xf32, #tpu.memory_space<vmem>>, %arg2: memref<32x128xf32, #tpu.memory_space<vmem>>, %arg3: memref<1x128xf32, #tpu.memory_space<vmem>>, %arg4: memref<128x128xf32, #tpu.memory_space<vmem>>, %arg5: memref<1x128xf32, #tpu.memory_space<vmem>>, %arg6: memref<8x128xf32, #tpu.memory_space<vmem>>) attributes {dimension_semantics = [#tpu.dimension_semantics<parallel>], iteration_bounds = array<i64: 1>, scalar_prefetch = 0 : i64, scratch_operands = 0 : i64, tpu.core_type = #tpu.core_type<tc>, window_params = [{transform_indices = @transform_0, window_bounds = array<i64: 8, 32>}, {pipeline_mode = #tpu.pipeline_mode<synchronous>, transform_indices = @transform_1, window_bounds = array<i64: 32, 128>}, {pipeline_mode = #tpu.pipeline_mode<synchronous>, transform_indices = @transform_2, window_bounds = array<i64: 1, 128>}, {pipeline_mode = #tpu.pipeline_mode<synchronous>, transform_indices = @transform_3, window_bounds = array<i64: 128, 128>}, {pipeline_mode = #tpu.pipeline_mode<synchronous>, transform_indices = @transform_4, window_bounds = array<i64: 1, 128>}, {transform_indices = @transform_5, window_bounds = array<i64: 8, 128>}]} {
    %c0 = arith.constant 0 : index
    %c0_0 = arith.constant 0 : index
    %0 = vector.load %arg1[%c0, %c0_0] : memref<8x32xf32, #tpu.memory_space<vmem>>, vector<8x32xf32>
    %c0_1 = arith.constant 0 : index
    %c0_2 = arith.constant 0 : index
    %1 = vector.load %arg2[%c0_1, %c0_2] : memref<32x128xf32, #tpu.memory_space<vmem>>, vector<32x128xf32>
    %cst = arith.constant dense<0.000000e+00> : vector<8x128xf32>
    %2 = tpu.matmul %0, %1, %cst {dimension_numbers = #tpu.dot_dimension_numbers<[1], [0], [0], [1], [0, 0, 1, 1], [], []>} : vector<8x32xf32>, vector<32x128xf32>, vector<8x128xf32> -> vector<8x128xf32>
    %c0_3 = arith.constant 0 : index
    %c0_4 = arith.constant 0 : index
    %3 = vector.load %arg3[%c0_3, %c0_4] : memref<1x128xf32, #tpu.memory_space<vmem>>, vector<1x128xf32>
    %4 = vector.broadcast %3 : vector<1x128xf32> to vector<8x128xf32>
    %5 = arith.addf %2, %4 : vector<8x128xf32>
    %cst_5 = arith.constant 0.000000e+00 : f32
    %6 = vector.broadcast %cst_5 : f32 to vector<8x128xf32>
    %7 = arith.maximumf %5, %6 : vector<8x128xf32>
    %c0_6 = arith.constant 0 : index
    %c0_7 = arith.constant 0 : index
    %8 = vector.load %arg4[%c0_6, %c0_7] : memref<128x128xf32, #tpu.memory_space<vmem>>, vector<128x128xf32>
    %cst_8 = arith.constant dense<0.000000e+00> : vector<8x128xf32>
    %9 = tpu.matmul %7, %8, %cst_8 {dimension_numbers = #tpu.dot_dimension_numbers<[1], [0], [0], [1], [0, 0, 1, 1], [], []>} : vector<8x128xf32>, vector<128x128xf32>, vector<8x128xf32> -> vector<8x128xf32>
    %c0_9 = arith.constant 0 : index
    %c0_10 = arith.constant 0 : index
    %10 = vector.load %arg5[%c0_9, %c0_10] : memref<1x128xf32, #tpu.memory_space<vmem>>, vector<1x128xf32>
    %11 = vector.broadcast %10 : vector<1x128xf32> to vector<8x128xf32>
    %12 = arith.addf %9, %11 : vector<8x128xf32>
    %c0_11 = arith.constant 0 : index
    %c0_12 = arith.constant 0 : index
    %13 = vector.load %arg6[%c0_11, %c0_12] : memref<8x128xf32, #tpu.memory_space<vmem>>, vector<8x128xf32>
    tpu.vector_store %arg6[%c0_11, %c0_12], %12 {strides = array<i32>} : memref<8x128xf32, #tpu.memory_space<vmem>>, vector<8x128xf32>,
    return
  }
  func.func @transform_0(%arg0: i32) -> (i32, i32) {
    %c0_i32 = arith.constant 0 : i32
    %c0_i32_0 = arith.constant 0 : i32
    return %arg0, %c0_i32 : i32, i32
  }
  func.func @transform_1(%arg0: i32) -> (i32, i32) {
    %c0_i32 = arith.constant 0 : i32
    %c0_i32_0 = arith.constant 0 : i32
    %c0_i32_1 = arith.constant 0 : i32
    return %c0_i32, %c0_i32_0 : i32, i32
  }
  func.func @transform_2(%arg0: i32) -> (i32, i32) {
    %c0_i32 = arith.constant 0 : i32
    %c0_i32_0 = arith.constant 0 : i32
    %c0_i32_1 = arith.constant 0 : i32
    return %c0_i32, %c0_i32_0 : i32, i32
  }
  func.func @transform_3(%arg0: i32) -> (i32, i32) {
    %c0_i32 = arith.constant 0 : i32
    %c0_i32_0 = arith.constant 0 : i32
    %c0_i32_1 = arith.constant 0 : i32
    return %c0_i32, %c0_i32_0 : i32, i32
  }
  func.func @transform_4(%arg0: i32) -> (i32, i32) {
    %c0_i32 = arith.constant 0 : i32
    %c0_i32_0 = arith.constant 0 : i32
    %c0_i32_1 = arith.constant 0 : i32
    return %c0_i32, %c0_i32_0 : i32, i32
  }
  func.func @transform_5(%arg0: i32) -> (i32, i32) {
    %c0_i32 = arith.constant 0 : i32
    %c0_i32_0 = arith.constant 0 : i32
    return %arg0, %c0_i32 : i32, i32
  }
}

</mosaic_0001>

<bundles_post_ra>
// kernel: _mlp_forward_impl.1
= control target key start
LH: loop header
LB: loop body
LE: loop exit
PB: predicated region body
PF: predicated region fallthrough
CT: control target
= control target key end

     0   :  { %v345_v3 = vmov 0.0|0.0   ;;  %vm346_vm0 = vmmov 0   ;;  %v347_v6 = vmov 0.0   ;;  %s460_s0 = inlined_call_operand.vmem [shape: f32[8,32], index: 0, kind: input, shape index: {}]   ;;  %s461_s1 = inlined_call_operand.vmem [shape: f32[32,128], index: 1, kind: input, shape index: {}]   ;;  %s462_s2 = inlined_call_operand.vmem [shape: f32[1,128], index: 2, kind: input, shape index: {}]   ;;  %s463_s3 = inlined_call_operand.vmem [shape: f32[128,128], index: 3, kind: input, shape index: {}]   ;;  %s464_s4 = inlined_call_operand.vmem [shape: f32[1,128], index: 4, kind: input, shape index: {}]   ;;  %s465_s5 = inlined_call_operand.hbm [shape: f32[8,128], index: 5, kind: output, shape index: {}]  }
   0x1   :  { %v22_v0 = vld [vmem:[%s461_s1] sm:$0xff]  ;;  %v23_v1 = vld [vmem:[%s461_s1 + $0x8] sm:$0xff]  ;;  %v24_v2 = vld [vmem:[%s461_s1 + $0x10] sm:$0xff]  ;;  %287 = vmatprep.subr.bf16.mxu0 %v345_v3  ;;  %249 = vmatprep.mubr.msk.f32.mxu0 %vm346_vm0, %v347_v6 }
   0x2   :  { %v288_v4 = vpack.c.bf16 %v23_v1, %v22_v0  ;;  %v25_v5 = vld [vmem:[%s461_s1 + $0x18] sm:$0xff]  ;;  %v108_v7 = vld [vmem:[%s463_s3] sm:$0xff]  ;;  %293 = vmatprep.subr.bf16.mxu1 %v345_v3  ;;  %v109_v8 = vld [vmem:[%s463_s3 + $0x8] sm:$0xff]  ;;  %284 = vmatprep.mubr.msk.f32.mxu1 %vm346_vm0, %v347_v6 }
   0x3   :  { %v110_v9 = vld [vmem:[%s463_s3 + $0x10] sm:$0xff]  ;;  %v111_v10 = vld [vmem:[%s463_s3 + $0x18] sm:$0xff]  ;;  %v291_v11 = vpack.c.bf16 %v25_v5, %v24_v2  ;;  %v294_v12 = vpack.c.bf16 %v109_v8, %v108_v7  ;;  %v112_v14 = vld [vmem:[%s463_s3 + $0x20] sm:$0xff] }
   0x4   :  { %289 = vmatpush3.bf16.msra.mxu0 %v288_v4  ;;  %v297_v13 = vpack.c.bf16 %v111_v10, %v110_v9  ;;  %v113_v15 = vld [vmem:[%s463_s3 + $0x28] sm:$0xff] }
   0x5   :  { %290 = vmatprep.subr.bf16.mxu0 %v345_v3  ;;  %295 = vmatpush3.bf16.msra.mxu1 %v294_v12 }
   0x6   :  { %296 = vmatprep.subr.bf16.mxu1 %v345_v3 }
   0x7   :  { %10 = vsyncpa [#allocation3], 0  ;;  %v21_v16 = vld [vmem:[%s460_s0] sm:$0xff]  ;;  %vm33_vm1 = vcmask 261120   ;;  %v300_v17 = vpack.c.bf16 %v113_v15, %v112_v14  ;;  %v114_v18 = vld [vmem:[%s463_s3 + $0x30] sm:$0xff]  ;;  %s348_s11 = smov [#allocation2]  }
   0x8   :  { %292 = vmatpush3.bf16.msra.mxu0 %v291_v11  ;;  %v115_v19 = vld [vmem:[%s463_s3 + $0x38] sm:$0xff]  ;;  %v116_v21 = vld [vmem:[%s463_s3 + $0x40] sm:$0xff]  ;;  %v117_v22 = vld [vmem:[%s463_s3 + $0x48] sm:$0xff]  ;;  %s208_s12 = sshll.u32 %s348_s11, 4  ;;  %s209_s12 = int_to_ptr.vmem [resolvable:$true] %s208_s12 }
   0x9   :  { %298 = vmatpush3.bf16.msra.mxu1 %v297_v13  ;;  %v303_v20 = vpack.c.bf16 %v115_v19, %v114_v18  ;;  %v306_v23 = vpack.c.bf16 %v117_v22, %v116_v21  ;;  %v118_v24 = vld [vmem:[%s463_s3 + $0x50] sm:$0xff]  ;;  %v119_v25 = vld [vmem:[%s463_s3 + $0x58] sm:$0xff]  ;;  %v120_v27 = vld [vmem:[%s463_s3 + $0x60] sm:$0xff]  ;;  %p326_p1 = scmp.lt.s32.totalorder %s209_s12, %s209_s12 }
   0xa   :  { %299 = vmatprep.subr.bf16.mxu1 %v345_v3  ;;  %v309_v26 = vpack.c.bf16 %v119_v25, %v118_v24  ;;  %v121_v28 = vld [vmem:[%s463_s3 + $0x68] sm:$0xff]  ;;  %v122_v30 = vld [vmem:[%s463_s3 + $0x70] sm:$0xff]  ;;  %v123_v31 = vld [vmem:[%s463_s3 + $0x78] sm:$0xff]  ;;  %s321_s3 = scalar_lea.vmem %s209_s12, 128 }
   0xb   :  { %250 = vmatmul.mubr.msk.f32.vlgmr.msra.gmra.mrb[0].mxu0 %vm33_vm1, %v21_v16  ;;  %v312_v29 = vpack.c.bf16 %v121_v28, %v120_v27  ;;  %v315_v32 = vpack.c.bf16 %v123_v31, %v122_v30  ;;  %v216_v33 = vld [vmem:[%s462_s2] ss:$0 sm:$0xff]  ;;  %p322_p0 = scmp.ne.s32.totalorder %s209_s12, %s321_s3  ;;  %p327_p2 = scmp.lt.s32.totalorder %s321_s3, %s321_s3 }
   0xc   :  { %v218_v38 = vld [vmem:[%s464_s4] ss:$0 sm:$0xff] }
   0xd   :  { %301 = vmatpush3.bf16.msra.mxu1 %v300_v17  ;;  %p328_p3 = por %p327_p2, %p326_p1 }
   0xe   :  { %302 = vmatprep.subr.bf16.mxu1 %v345_v3 }
   0xf   :  { %p329_p4 = pnand %p328_p3, %p322_p0 }
  0x11   :  { %304 = vmatpush3.bf16.msra.mxu1 %v303_v20 }
  0x12   :  { %305 = vmatprep.subr.bf16.mxu1 %v345_v3 }
  0x15   :  { %307 = vmatpush3.bf16.msra.mxu1 %v306_v23 }
  0x16   :  { %308 = vmatprep.subr.bf16.mxu1 %v345_v3 }
  0x19   :  { %310 = vmatpush3.bf16.msra.mxu1 %v309_v26 }
  0x1a   :  { %311 = vmatprep.subr.bf16.mxu1 %v345_v3 }
  0x1d   :  { %313 = vmatpush3.bf16.msra.mxu1 %v312_v29 }
  0x1e   :  { %314 = vmatprep.subr.bf16.mxu1 %v345_v3 }
  0x21   :  { %316 = vmatpush3.bf16.msra.mxu1 %v315_v32 }
  0xde   :  { %v103_v34 = vpop.f32.mrb[0].mxu0 }
  0xdf   :  { %v104_v35 = vadd.f32 %v216_v33, %v103_v34  ;;  %v251_v36 = vpop.f32.mrb[1].mxu0 }
  0xe1   :  { %v107_v37 = vmax.f32 %v104_v35, 0.0 }
  0xe3   :  { %285 = vmatmul.mubr.f32.vlgmr.msra.gmra.mrb[0].mxu1 %v107_v37 }
 0x1b6   :  { %v197_v39 = vpop.f32.mrb[0].mxu1 }
 0x1b7   :  { %v198_v40 = vadd.f32 %v218_v38, %v197_v39  ;;  %v286_v41 = vpop.f32.mrb[1].mxu1 }
 0x1b9   :  { %201 = vst [vmem:[#allocation2] sm:$0xff] %v198_v40 }
 0x1ba   :  { %332 = shalt.err (!%p329_p4)
}
 0x1bb   :  { %s333_s14 = scalar_lea.hbm %s465_s5, 128 }
 0x1bc   :  { %p334_p5 = scmp.ne.s32.totalorder %s465_s5, %s333_s14  ;;  %p337_p6 = scmp.lt.u32.totalorder %s333_s14, %s465_s5 }
 0x1be   :  { %p339_p7 = pnand %p337_p6, %p334_p5 }
 0x1c0   :  { %342 = shalt.err (!%p339_p7)
}
 0x1c1   :  { %211 = dma.vmem_to_hbm [thread:$0]  %s209_s12, 128, %s465_s5, [#allocation3]  }
 0x1c2   :  { %343 = dma.done.wait [#allocation3], 128  }
 0x1c3   :  { %344 = vsyncadd [#allocation3], 4294967168 }
 0x1c4   :  { %215 = vsyncpa [#allocation3], 1 }

</bundles_post_ra>
